<compile_context>
chip_gen: v6e
topology: v6e:2x2x1
jax: 0.10.0
libtpu: 0.0.40
codegen_flags: <defaults>
</compile_context>

<pallas_src>
import functools

import jax
import jax.numpy as jnp
from jax.experimental import pallas as pl
from jax.experimental.pallas import tpu as pltpu


def _decompose_kernel(x_ref, season_ref, trend_ref, xpad_scr, *,
                      kernel_size, pad_left, pad_right):
    # x_ref:               (Bt, L, C)       input block (auto-pipelined from HBM)
    # season_ref/trend_ref:(Bt, L, C)       output blocks
    # xpad_scr:            (Bt, L+k-1, C)   VMEM scratch for the replicate-padded seq
    Bt, L, C = x_ref.shape

    x = x_ref[...]  # single block load; everything below is VMEM/vreg work

    # Replicate-pad along time into VMEM (no HBM round trip for the padded copy).
    xpad_scr[:, pad_left:pad_left + L, :] = x
    if pad_left > 0:
        xpad_scr[:, 0:pad_left, :] = jnp.broadcast_to(
            x[:, 0:1, :], (Bt, pad_left, C))
    if pad_right > 0:
        xpad_scr[:, pad_left + L:pad_left + L + pad_right, :] = jnp.broadcast_to(
            x[:, L - 1:L, :], (Bt, pad_right, C))

    # Sliding-window sum: trend[t] = mean(xpad[t : t + k]).
    # kernel_size is small and static -> unrolled VPU adds on VMEM-resident data.
    acc = jnp.zeros((Bt, L, C), dtype=jnp.float32)
    for j in range(kernel_size):
        acc = acc + xpad_scr[:, j:j + L, :].astype(jnp.float32)

    trend = acc * (1.0 / kernel_size)
    season = x.astype(jnp.float32) - trend

    trend_ref[...] = trend.astype(trend_ref.dtype)
    season_ref[...] = season.astype(season_ref.dtype)


def _choose_batch_tile(B, L, C, itemsize, kernel_size):
    """Pick how many batch elements to pack per grid step.

    Budget ~8 MiB of pipeline VMEM per step (double-buffered input + two
    double-buffered outputs + padded scratch + f32 temporaries) so the same
    tile choice is safe on v5e/v6e (128 MiB VMEM) and v7x (64 MiB VMEM).
    Prefer >=2 grid steps so v7x's two TensorCores both get work.
    """
    Lp = L + kernel_size - 1
    bytes_per_b = (6 * L * C * itemsize      # dbuf input + 2 dbuf outputs
                   + Lp * C * itemsize       # VMEM padded scratch
                   + 2 * L * C * 4)          # f32 accumulator / temporaries
    budget = 8 * 1024 * 1024
    bt_max = max(1, budget // max(1, bytes_per_b))
    divisors = [d for d in range(1, B + 1) if B % d == 0 and d <= bt_max]
    if not divisors:
        return 1
    multi_step = [d for d in divisors if B // d >= 2]
    return max(multi_step) if multi_step else max(divisors)


def decompose_sequence(x, kernel_size, stride=1):
    """Return (season, trend), matching DecomposeSequence.forward on (B, L, C)."""
    assert stride == 1, "forward() semantics (season = x - trend) require stride == 1"
    B, L, C = x.shape

    pad_left = (kernel_size - 1) // 2
    pad_right = kernel_size // 2 if kernel_size % 2 == 0 else (kernel_size - 1) // 2
    Lp = L + kernel_size - 1

    itemsize = jnp.dtype(x.dtype).itemsize
    Bt = _choose_batch_tile(B, L, C, itemsize, kernel_size)
    grid = (B // Bt,)

    # TODO(synk): if C stays far below 128 in production shapes, a wrapper-side
    # transpose to a lane-dense layout could further cut masked-store overhead.

    kernel = functools.partial(
        _decompose_kernel,
        kernel_size=kernel_size, pad_left=pad_left, pad_right=pad_right)

    season, trend = pl.pallas_call(
        kernel,
        out_shape=(
            jax.ShapeDtypeStruct((B, L, C), x.dtype),
            jax.ShapeDtypeStruct((B, L, C), x.dtype),
        ),
        grid_spec=pltpu.PrefetchScalarGridSpec(
            num_scalar_prefetch=0,
            grid=grid,
            in_specs=[
                pl.BlockSpec((Bt, L, C), lambda b: (b, 0, 0)),
            ],
            out_specs=[
                pl.BlockSpec((Bt, L, C), lambda b: (b, 0, 0)),
                pl.BlockSpec((Bt, L, C), lambda b: (b, 0, 0)),
            ],
            scratch_shapes=[
                pltpu.VMEM((Bt, Lp, C), x.dtype),
            ],
        ),
        compiler_params=pltpu.CompilerParams(
            dimension_semantics=("parallel",),
            vmem_limit_bytes=32 * 1024 * 1024,
        ),
    )(x)
    return season, trend


def _decompose_reference(x, kernel_size):
    """Pure-JAX reference mirroring the PyTorch module (stride=1)."""
    padding_left = (kernel_size - 1) // 2
    padding_right = kernel_size // 2 if kernel_size % 2 == 0 else (kernel_size - 1) // 2
    front = jnp.repeat(x[:, 0:1, :], padding_left, axis=1)
    end = jnp.repeat(x[:, -1:, :], padding_right, axis=1)
    x_pad = jnp.concatenate([front, x, end], axis=1)
    L = x.shape[1]
    windows = jnp.stack([x_pad[:, j:j + L, :] for j in range(kernel_size)], axis=0)
    trend = jnp.mean(windows, axis=0)
    season = x - trend
    return season, trend


if __name__ == "__main__":
    B, L, C = 2, 16, 32
    kernel_size, stride = 4, 1  # even kernel exercises asymmetric padding

    key = jax.random.PRNGKey(0)
    x = jax.random.normal(key, (B, L, C), dtype=jnp.float32)

    season, trend = decompose_sequence(x, kernel_size, stride)
    jax.block_until_ready((season, trend))

    season_ref, trend_ref = _decompose_reference(x, kernel_size)
    assert jnp.allclose(trend, trend_ref, atol=1e-5, rtol=1e-5)
    assert jnp.allclose(season, season_ref, atol=1e-5, rtol=1e-5)

    print("KERNEL_OK")
</pallas_src>

<mosaic_0001>
module attributes {stable_mosaic.version = 11 : i64} {
  func.func @_decompose_kernel(%arg0: i32, %arg1: memref<1x16x32xf32, #tpu.memory_space<vmem>>, %arg2: memref<1x16x32xf32, #tpu.memory_space<vmem>>, %arg3: memref<1x16x32xf32, #tpu.memory_space<vmem>>, %arg4: memref<1x19x32xf32, #tpu.memory_space<vmem>>) attributes {dimension_semantics = [#tpu.dimension_semantics<parallel>], iteration_bounds = array<i64: 2>, scalar_prefetch = 0 : i64, scratch_operands = 1 : i64, tpu.core_type = #tpu.core_type<tc>, window_params = [{transform_indices = @transform_0, window_bounds = array<i64: 1, 16, 32>}, {transform_indices = @transform_1, window_bounds = array<i64: 1, 16, 32>}, {transform_indices = @transform_2, window_bounds = array<i64: 1, 16, 32>}]} {
    %c0 = arith.constant 0 : index
    %c0_0 = arith.constant 0 : index
    %c0_1 = arith.constant 0 : index
    %0 = vector.load %arg1[%c0, %c0_0, %c0_1] : memref<1x16x32xf32, #tpu.memory_space<vmem>>, vector<1x16x32xf32>
    %c0_2 = arith.constant 0 : index
    %c1 = arith.constant 1 : index
    %c0_3 = arith.constant 0 : index
    %1 = vector.load %arg4[%c0_2, %c1, %c0_3] : memref<1x19x32xf32, #tpu.memory_space<vmem>>, vector<1x16x32xf32>
    tpu.vector_store %arg4[%c0_2, %c1, %c0_3], %0 {strides = array<i32>} : memref<1x19x32xf32, #tpu.memory_space<vmem>>, vector<1x16x32xf32>,
    %2 = vector.extract_strided_slice %0 {offsets = [0, 0, 0], sizes = [1, 1, 32], strides = [1, 1, 1]} : vector<1x16x32xf32> to vector<1x1x32xf32>
    %c0_4 = arith.constant 0 : index
    %c0_5 = arith.constant 0 : index
    %c0_6 = arith.constant 0 : index
    %3 = vector.load %arg4[%c0_4, %c0_5, %c0_6] : memref<1x19x32xf32, #tpu.memory_space<vmem>>, vector<1x1x32xf32>
    tpu.vector_store %arg4[%c0_4, %c0_5, %c0_6], %2 {strides = array<i32>} : memref<1x19x32xf32, #tpu.memory_space<vmem>>, vector<1x1x32xf32>,
    %4 = vector.extract_strided_slice %0 {offsets = [0, 15, 0], sizes = [1, 1, 32], strides = [1, 1, 1]} : vector<1x16x32xf32> to vector<1x1x32xf32>
    %5 = vector.shape_cast %4 : vector<1x1x32xf32> to vector<1x1x32xf32>
    %6 = vector.broadcast %5 : vector<1x1x32xf32> to vector<1x2x32xf32>
    %c0_7 = arith.constant 0 : index
    %c17 = arith.constant 17 : index
    %c0_8 = arith.constant 0 : index
    %7 = vector.load %arg4[%c0_7, %c17, %c0_8] : memref<1x19x32xf32, #tpu.memory_space<vmem>>, vector<1x2x32xf32>
    tpu.vector_store %arg4[%c0_7, %c17, %c0_8], %6 {strides = array<i32>} : memref<1x19x32xf32, #tpu.memory_space<vmem>>, vector<1x2x32xf32>,
    %cst = arith.constant 0.000000e+00 : f32
    %8 = vector.broadcast %cst : f32 to vector<1x16x32xf32>
    %c0_9 = arith.constant 0 : index
    %c0_10 = arith.constant 0 : index
    %c0_11 = arith.constant 0 : index
    %9 = vector.load %arg4[%c0_9, %c0_10, %c0_11] : memref<1x19x32xf32, #tpu.memory_space<vmem>>, vector<1x16x32xf32>
    %10 = arith.addf %8, %9 : vector<1x16x32xf32>
    %c0_12 = arith.constant 0 : index
    %c1_13 = arith.constant 1 : index
    %c0_14 = arith.constant 0 : index
    %11 = vector.load %arg4[%c0_12, %c1_13, %c0_14] : memref<1x19x32xf32, #tpu.memory_space<vmem>>, vector<1x16x32xf32>
    %12 = arith.addf %10, %11 : vector<1x16x32xf32>
    %c0_15 = arith.constant 0 : index
    %c2 = arith.constant 2 : index
    %c0_16 = arith.constant 0 : index
    %13 = vector.load %arg4[%c0_15, %c2, %c0_16] : memref<1x19x32xf32, #tpu.memory_space<vmem>>, vector<1x16x32xf32>
    %14 = arith.addf %12, %13 : vector<1x16x32xf32>
    %c0_17 = arith.constant 0 : index
    %c3 = arith.constant 3 : index
    %c0_18 = arith.constant 0 : index
    %15 = vector.load %arg4[%c0_17, %c3, %c0_18] : memref<1x19x32xf32, #tpu.memory_space<vmem>>, vector<1x16x32xf32>
    %16 = arith.addf %14, %15 : vector<1x16x32xf32>
    %cst_19 = arith.constant 2.500000e-01 : f32
    %17 = vector.broadcast %cst_19 : f32 to vector<1x16x32xf32>
    %18 = arith.mulf %16, %17 : vector<1x16x32xf32>
    %19 = arith.subf %0, %18 : vector<1x16x32xf32>
    %c0_20 = arith.constant 0 : index
    %c0_21 = arith.constant 0 : index
    %c0_22 = arith.constant 0 : index
    %20 = vector.load %arg3[%c0_20, %c0_21, %c0_22] : memref<1x16x32xf32, #tpu.memory_space<vmem>>, vector<1x16x32xf32>
    tpu.vector_store %arg3[%c0_20, %c0_21, %c0_22], %18 {strides = array<i32>} : memref<1x16x32xf32, #tpu.memory_space<vmem>>, vector<1x16x32xf32>,
    %c0_23 = arith.constant 0 : index
    %c0_24 = arith.constant 0 : index
    %c0_25 = arith.constant 0 : index
    %21 = vector.load %arg2[%c0_23, %c0_24, %c0_25] : memref<1x16x32xf32, #tpu.memory_space<vmem>>, vector<1x16x32xf32>
    tpu.vector_store %arg2[%c0_23, %c0_24, %c0_25], %19 {strides = array<i32>} : memref<1x16x32xf32, #tpu.memory_space<vmem>>, vector<1x16x32xf32>,
    return
  }
  func.func @transform_0(%arg0: i32) -> (i32, i32, i32) {
    %c0_i32 = arith.constant 0 : i32
    %c0_i32_0 = arith.constant 0 : i32
    %c0_i32_1 = arith.constant 0 : i32
    return %arg0, %c0_i32, %c0_i32_0 : i32, i32, i32
  }
  func.func @transform_1(%arg0: i32) -> (i32, i32, i32) {
    %c0_i32 = arith.constant 0 : i32
    %c0_i32_0 = arith.constant 0 : i32
    %c0_i32_1 = arith.constant 0 : i32
    return %arg0, %c0_i32, %c0_i32_0 : i32, i32, i32
  }
  func.func @transform_2(%arg0: i32) -> (i32, i32, i32) {
    %c0_i32 = arith.constant 0 : i32
    %c0_i32_0 = arith.constant 0 : i32
    %c0_i32_1 = arith.constant 0 : i32
    return %arg0, %c0_i32, %c0_i32_0 : i32, i32, i32
  }
}

</mosaic_0001>

<bundles_post_ra>
// kernel: tpu_custom_call.1
= control target key start
LH: loop header
LB: loop body
LE: loop exit
PB: predicated region body
PF: predicated region fallthrough
CT: control target
= control target key end

     0   :  { %8 = vsyncpa [#allocation4], 0  ;;  %s781_s0 = inlined_call_operand.hbm [shape: f32[2,16,32], index: 0, kind: input, shape index: {}]   ;;  %s782_s1 = inlined_call_operand.hbm [shape: f32[2,16,32], index: 1, kind: output, shape index: {0}]   ;;  %s783_s2 = inlined_call_operand.hbm [shape: f32[2,16,32], index: 2, kind: output, shape index: {1}]  }
   0x1   :  { %10 = vsyncpa [#allocation4 + $0x1], 0 }
   0x2   :  { %11 = vsyncpa [#allocation5], 0 }
   0x3   :  { %13 = vsyncpa [#allocation5 + $0x1], 0 }
   0x4   :  { %14 = vsyncpa [#allocation8], 0 }
   0x5   :  { %16 = vsyncpa [#allocation8 + $0x1], 0  ;;  %s572_s9 = smov 0   ;;  %s574_s10 = smov 0  }
   0x6   :  { %s576_s11 = smov 0   ;;  %s578_s12 = smov 0  }
   0x7 LB: > { %s593_s13 = sadd.s32 4294967295, %s548_s12   ;;  %s350_s14 = sadd.s32 4294967294, %s548_s12   ;;  %s548_s12 = sphi %s578_s12, %s798_s12   ;;  %s544_s11 = sphi %s576_s11, %s797_s11   ;;  %s540_s10 = sphi %s574_s10, %s796_s10   ;;  %s536_s9 = sphi %s572_s9, %s795_s9  }
   0x8   : > { %s597_s15 = sadd.s32 1, %s548_s12   ;;  %s29_s16 = sadd.s32 1, %s544_s11 }
   0x9   : > { %s26_s17 = ssub.s32 %s548_s12, %s597_s15  ;;  %p36_p0 = scmp.ne.s32.totalorder %s544_s11, %s540_s10 }
   0xa   : > { %p27_p1 = scmp.eq.s32.totalorder %s26_s17, 0  ;;  %p37_p2 = scmp.eq.s32.totalorder %s548_s12, 0 }
   0xb   : > { %p42_p3 = scmp.ne.s32.totalorder %s540_s10, %s536_s9  ;;  %p43_p4 = scmp.eq.s32.totalorder %s593_s13, 0 }
   0xc   : > { %s609_s18 = scalar_select %p27_p1, %s544_s11, %s29_s16  }
   0xd   : > { %p611_p5 = por %p37_p2, %p36_p0  ;;  %p615_p6 = por %p43_p4, %p42_p3 }
   0xe   : > { %p66_p7 = scmp.eq.s32.totalorder %s593_s13, 1  ;;  %p72_p8 = scmp.eq.s32.totalorder %s350_s14, 1 }
   0xf   : > { %s787_s20 = scalar_select %p615_p6, 1, 0 }
  0x10   : > { %p388_p10 = scmp.lt.s32.totalorder %s548_s12, 2  ;;  %p622_p11 = por %p66_p7, %p36_p0 }
  0x11   : > { %p626_p12 = por %p72_p8, %p42_p3  ;;  %s118_s23 = sand.u32 1, %s544_s11  }
  0x12   : > { %s788_s21 = scalar_select %p622_p11, 1, 0 }
  0x13   : > { %s789_s22 = scalar_select %p626_p12, 1, 0 }
  0x14   : > { %s368_s24 = sshll.u32 %s548_s12, 8  ;;  %s353_s25 = sshll.u32 %s118_s23, 4 }
  0x15   : > { %s635_s28 = scalar_lea.hbm %s781_s0, %s368_s24  ;;  %s122_s29 = scalar_lea.vmem [#allocation3], %s353_s25 }
  0x16   : > { %s129_s30 = sshll.u32 %s122_s29, 4  ;;  %p639_p13 = pnand %p388_p10, %p611_p5  ;;  %s643_s30 = int_to_ptr.vmem [resolvable:$true] %s129_s30 }
  0x17   : > { %s645_s4 = scalar_lea.sflag [#allocation4], %s118_s23  ;;  %s426_s5 = scalar_lea.hbm %s635_s28, 256 }
  0x18   : > { %p427_p0 = scmp.ne.s32.totalorder %s635_s28, %s426_s5  ;;  %p428_p1 = pneg %p639_p13 }
  0x19   : > { %s431_s8 = scalar_lea.hbm %s781_s0, 512  ;;  %p432_p4 = scmp.lt.s32.totalorder %s635_s28, %s781_s0 }
  0x1a   : > { %p429_p2 = pnand %p428_p1, %p427_p0  ;;  %p433_p5 = scmp.lt.s32.totalorder %s431_s8, %s426_s5 }
  0x1c   : > { %p430_p3 = pneg %p429_p2  ;;  %p434_p7 = por %p433_p5, %p432_p4 }
  0x1e   : > { %p435_p8 = pnand %p434_p7, %p430_p3 }
  0x20   : > { %438 = shalt.err (!%p435_p8)
}
  0x21   : > { %s439_s17 = scalar_lea.vmem %s643_s30, 256  ;;  %s550_s19 = smov [#allocation3]  }
  0x22   : > { %p440_p10 = scmp.ne.s32.totalorder %s643_s30, %s439_s17  ;;  %s444_s23 = sshll.u32 %s550_s19, 4  ;;  %s445_s23 = int_to_ptr.vmem [resolvable:$false] %s444_s23 }
  0x23   : > { %s446_s24 = scalar_lea.vmem %s445_s23, 512  ;;  %p447_p2 = scmp.lt.s32.totalorder %s643_s30, %s445_s23 }
  0x24   : > { %p442_p9 = pnand %p440_p10, %p428_p1  ;;  %p448_p12 = scmp.lt.s32.totalorder %s446_s24, %s439_s17 }
  0x26   : > { %p443_p0 = pneg %p442_p9  ;;  %p449_p11 = por %p448_p12, %p447_p2 }
  0x28   : > { %p450_p6 = pnand %p449_p11, %p443_p0 }
  0x2a   : > { %453 = shalt.err (!%p450_p6)
}
  0x2b   : > { %s551_s25 = smov 128   ;;  %s552_s26 = smov 8  }
  0x2c   : > { %380 = dma.hbm_to_vmem [thread:$0]  (!%p639_p13), %s635_s28, 256, %s643_s30, %s645_s4, %s551_s25, %s551_s25, %s552_s26  }
  0x2d   : > { %p356_p9 = scmp.ge.s32.totalorder %s548_s12, 1  ;;  %p137_p1 = scmp.lt.s32.totalorder %s548_s12, 3 }
  0x2f   : > { %p138_p3 = pnand %p356_p9, %p137_p1 }
  0x30   : > { %s669_s27 = sand.u32 (!%p138_p3), 1, %s540_s10   ;;  %p791_p6 = scmp.ne.s32.totalorder (!%p138_p3), %s787_s20, 0 }
  0x31   : > { %141 = sbr.rel (%p138_p3) target bundleno = 113 (0x71), region = 24  ;;  %s672_s29 = sshll.u32 (!%p138_p3), %s669_s27, 4 }
  0x32   : > { %s144_s5 = scalar_lea.sflag (!%p138_p3), [#allocation4], %s669_s27  ;;  %s147_s6 = scalar_lea.vmem (!%p138_p3), [#allocation3], %s672_s29 }
  0x36   : > { %523 = dma.done.wait (%p791_p6), %s144_s5, 256  }
  0x37   : > { %525 = vsyncadd (%p791_p6), %s144_s5, 4294967040  ;;  %v180_v0 = vlaneseq  ;;  %vm175_vm0 = vcmask 261120   ;;  %vm178_vm1 = vcmask 253952   ;;  %v173_v3 = vld [vmem:[%s147_s6] sm:$0xff]  ;;  %v680_v4 = vld [vmem:[%s147_s6 + $0x8] sm:$0xff]  ;;  %vm184_vm2 = vcmask 254976  }
  0x38   : > { %176 = vst.msk [vmem:[#allocation2 + $0x1] sm:$0xff] %vm175_vm0, %v173_v3  ;;  %177 = vst.msk [vmem:[#allocation2 + $0x9] sm:$0xff] %vm175_vm0, %v680_v4  ;;  %s172_s20 = scalar_lea.vmem [#allocation7], %s672_s29  ;;  %s369_s30 = sshll.u32 %s593_s13, 8 }
  0x39   : > { %v181_v1 = vshrl.u32 %v180_v0, 7  ;;  %179 = vst.msk [vmem:[#allocation2] sm:$0x1] %vm178_vm1, %v173_v3  ;;  %s245_s28 = sshll.u32 %s172_s20, 4  ;;  %s691_s3 = scalar_lea.vmem [#allocation6], %s672_s29  ;;  %s688_s28 = int_to_ptr.vmem [resolvable:$true] %s245_s28 }
  0x3a   : > { %s229_s4 = sshll.u32 %s691_s3, 4  ;;  %s697_s14 = scalar_lea.hbm %s783_s2, %s369_s30  ;;  %s700_s4 = int_to_ptr.vmem [resolvable:$true] %s229_s4 }
  0x3b   : > { %v182_v2 = vsub.s32 7, %v181_v1  ;;  %s707_s17 = scalar_lea.hbm %s782_s1, %s369_s30  ;;  %s216_s19 = scalar_lea.sflag [#allocation8], %s669_s27 }
  0x3c   : > { %s454_s23 = scalar_lea.vmem %s688_s28, 256  ;;  %p792_p12 = scmp.ne.s32.totalorder %s788_s21, 0 }
  0x3d   : > { %v183_v5 = vrot.slane %v680_v4, %v182_v2  ;;  %p455_p11 = scmp.ne.s32.totalorder %s688_s28, %s454_s23  ;;  %s553_s24 = smov [#allocation7]  }
  0x3e   : > { %s458_s25 = sshll.u32 %s553_s24, 4  ;;  %s459_s25 = int_to_ptr.vmem [resolvable:$false] %s458_s25 }
  0x3f   : > { %185 = vst.msk [vmem:[#allocation2 + $0x11] sm:$0x3] %vm184_vm2, %v183_v5  ;;  %v190_v7 = vld [vmem:[#allocation2 + $0x1] sm:$0xff]  ;;  %v191_v10 = vld [vmem:[#allocation2 + $0x9] sm:$0xff]  ;;  %p456_p13 = pnand %p455_p11, %p792_p12  ;;  %s460_s26 = scalar_lea.vmem %s459_s25, 512 }
  0x40   : > { %v186_v6 = vld [vmem:[#allocation2] sm:$0xff]  ;;  %v187_v9 = vld [vmem:[#allocation2 + $0x8] sm:$0xff]  ;;  %p461_p5 = scmp.lt.s32.totalorder %s688_s28, %s459_s25  ;;  %p462_p7 = scmp.lt.s32.totalorder %s460_s26, %s454_s23 }
  0x41   : > { %v192_v8 = vadd.f32 %v190_v7, %v186_v6  ;;  %v194_v11 = vld [vmem:[#allocation2 + $0x2] sm:$0xff]  ;;  %v193_v12 = vadd.f32 %v191_v10, %v187_v9  ;;  %p457_p4 = pneg %p456_p13 }
  0x42   : > { %v198_v15 = vld [vmem:[#allocation2 + $0x3] sm:$0xff]  ;;  %p463_p8 = por %p462_p7, %p461_p5 }
  0x43   : > { %v196_v14 = vadd.f32 %v194_v11, %v192_v8 }
  0x44   : > { %p464_p10 = pnand %p463_p8, %p457_p4 }
  0x45   : > { %v200_v17 = vadd.f32 %v198_v15, %v196_v14 }
  0x46   : > { %v195_v13 = vld [vmem:[#allocation2 + $0xa] sm:$0xff] }
  0x47   : > { %v197_v16 = vadd.f32 %v195_v13, %v193_v12  ;;  %v199_v18 = vld [vmem:[#allocation2 + $0xb] sm:$0xff]  ;;  %v202_v20 = vmul.f32 0.25, %v200_v17 }
  0x49   : > { %v201_v19 = vadd.f32 %v199_v18, %v197_v16  ;;  %206 = vst.msk [vmem:[%s172_s20] sm:$0xff] %vm175_vm0, %v202_v20  ;;  %v204_v22 = vsub.f32 %v173_v3, %v202_v20 }
  0x4b   : > { %v203_v21 = vmul.f32 0.25, %v201_v19  ;;  %208 = vst.msk [vmem:[%s691_s3] sm:$0xff] %vm175_vm0, %v204_v22 }
  0x4d   : > { %207 = vst.msk [vmem:[%s172_s20 + $0x8] sm:$0xff] %vm175_vm0, %v203_v21  ;;  %v205_v23 = vsub.f32 %v680_v4, %v203_v21 }
  0x4e   : > { %467 = shalt.err (!%p464_p10)
}
  0x4f   : > { %s468_s29 = scalar_lea.hbm %s697_s14, 256  ;;  %s472_s20 = scalar_lea.hbm %s783_s2, 512 }
  0x50   : > { %p469_p0 = scmp.ne.s32.totalorder %s697_s14, %s468_s29  ;;  %p473_p1 = scmp.lt.s32.totalorder %s697_s14, %s783_s2 }
  0x51   : > { %p474_p3 = scmp.lt.s32.totalorder %s472_s20, %s468_s29 }
  0x52   : > { %p470_p2 = pnand %p469_p0, %p792_p12 }
  0x53   : > { %p475_p6 = por %p474_p3, %p473_p1 }
  0x54   : > { %p471_p9 = pneg %p470_p2 }
  0x56   : > { %p476_p11 = pnand %p475_p6, %p471_p9 }
  0x58   : > { %479 = shalt.err (!%p476_p11)
}
  0x59   : > { %s554_s8 = smov 128   ;;  %s555_s13 = smov 8   ;;  %209 = vst.msk [vmem:[%s691_s3 + $0x8] sm:$0xff] %vm175_vm0, %v205_v23 }
  0x5a   : > { %374 = dma.vmem_to_hbm [thread:$0]  (%p792_p12), %s688_s28, 256, %s697_s14, %s216_s19, %s554_s8, %s554_s8, %s555_s13  }
  0x5b   : > { %s211_s16 = scalar_lea.sflag [#allocation5], %s669_s27  ;;  %s480_s23 = scalar_lea.vmem %s700_s4, 256 }
  0x5c   : > { %p481_p13 = scmp.ne.s32.totalorder %s700_s4, %s480_s23  ;;  %s556_s24 = smov [#allocation6]  }
  0x5d   : > { %s484_s25 = sshll.u32 %s556_s24, 4  ;;  %s485_s25 = int_to_ptr.vmem [resolvable:$false] %s484_s25 }
  0x5e   : > { %p482_p4 = pnand %p481_p13, %p792_p12  ;;  %s486_s26 = scalar_lea.vmem %s485_s25, 512 }
  0x5f   : > { %p487_p7 = scmp.lt.s32.totalorder %s700_s4, %s485_s25  ;;  %p488_p8 = scmp.lt.s32.totalorder %s486_s26, %s480_s23 }
  0x60   : > { %p483_p5 = pneg %p482_p4 }
  0x61   : > { %p489_p10 = por %p488_p8, %p487_p7 }
  0x63   : > { %p490_p0 = pnand %p489_p10, %p483_p5 }
  0x65   : > { %493 = shalt.err (!%p490_p0)
}
  0x66   : > { %s494_s28 = scalar_lea.hbm %s707_s17, 256  ;;  %s498_s14 = scalar_lea.hbm %s782_s1, 512 }
  0x67   : > { %p495_p2 = scmp.ne.s32.totalorder %s707_s17, %s494_s28  ;;  %p499_p3 = scmp.lt.s32.totalorder %s707_s17, %s782_s1 }
  0x68   : > { %p500_p6 = scmp.lt.s32.totalorder %s498_s14, %s494_s28 }
  0x69   : > { %p496_p9 = pnand %p495_p2, %p792_p12 }
  0x6a   : > { %p501_p11 = por %p500_p6, %p499_p3 }
  0x6b   : > { %p497_p1 = pneg %p496_p9 }
  0x6d   : > { %p502_p13 = pnand %p501_p11, %p497_p1 }
  0x6f   : > { %505 = shalt.err (!%p502_p13)
}
  0x70   : > { %373 = dma.vmem_to_hbm [thread:$0]  (%p792_p12), %s700_s4, 256, %s707_s17, %s211_s16, %s554_s8, %s554_s8, %s555_s13  }
  0x71 PF: > { %s260_s5 = sand.u32 1, %s536_s9   ;;  %p793_p4 = scmp.ne.s32.totalorder %s789_s22, 0 }
  0x72   : > { %p794_p5 = scmp.ge.s32.totalorder %s548_s12, 2  ;;  %s261_s6 = scalar_lea.sflag [#allocation5], %s260_s5 }
  0x74   : > { %p382_p7 = pnand %p794_p5, %p793_p4 }
  0x76   : > { %p383_p8 = pneg %p382_p7 }
  0x78   : > { %527 = dma.done.wait (%p383_p8), %s261_s6, 256  }
  0x79   : > { %529 = vsyncadd (%p383_p8), %s261_s6, 4294967040  ;;  %s270_s20 = scalar_lea.sflag [#allocation8], %s260_s5 }
  0x7a   : > { %531 = dma.done.wait (%p383_p8), %s270_s20, 256  }
  0x7b   : > { %533 = vsyncadd (%p383_p8), %s270_s20, 4294967040  ;;  %p19_p12 = scmp.ge.s32.totalorder %s597_s15, 4   ;;  %s795_s9 = smov %s540_s10 }
  0x7c   : > { %s796_s10 = smov %s544_s11  ;;  %s797_s11 = smov %s609_s18 }
  0x7d   : > { %s798_s12 = smov %s597_s15  ;;  %21 = sbr.rel (!%p19_p12) target bundleno = 7 (0x7), region = 86 }
  0x82   :  { %275 = vsyncpa [#allocation4], 1 }
  0x83   :  { %277 = vsyncpa [#allocation4 + $0x1], 1 }
  0x84   :  { %278 = vsyncpa [#allocation5], 1 }
  0x85   :  { %280 = vsyncpa [#allocation5 + $0x1], 1 }
  0x86   :  { %281 = vsyncpa [#allocation8], 1 }
  0x87   :  { %283 = vsyncpa [#allocation8 + $0x1], 1 }

</bundles_post_ra>
